<compile_context>
chip_gen: v5e
topology: v5e:2x2
jax: 0.10.0
libtpu: 0.0.40
codegen_flags: <defaults>
</compile_context>

<pallas_src>
import functools

import jax
import jax.numpy as jnp
from jax.experimental import pallas as pl
from jax.experimental.pallas import tpu as pltpu

EPS = 1e-5
NEG_SLOPE = 0.01  # F.leaky_relu default negative_slope
LANE = 128
SUBLANE = 8


def _round_up(x, m):
    return (x + m - 1) // m * m


def _stats_kernel(x_ref, w_ref, stats_ref):
    """Pass 1: conv matmul for one M-tile + per-channel partial sums.

    x_ref:     (TILE_M, K_pad)  im2col patch rows (zero padded rows/cols)
    w_ref:     (K_pad, F_pad)   weight matrix (zero padded)
    stats_ref: (8, F_pad)       row 0 = sum(y), row 1 = sum(y*y), rows 2-7 = 0
    """
    y = jnp.dot(x_ref[...], w_ref[...], preferred_element_type=jnp.float32)
    s = jnp.sum(y, axis=0, keepdims=True)        # (1, F_pad)
    ss = jnp.sum(y * y, axis=0, keepdims=True)   # (1, F_pad)
    pad = jnp.zeros((6, s.shape[1]), jnp.float32)
    stats_ref[...] = jnp.concatenate([s, ss, pad], axis=0)


def _apply_kernel(x_ref, w_ref, scale_ref, shift_ref, o_ref):
    """Pass 2: recompute conv tile, apply folded BN scale/shift + LeakyReLU.

    x_ref: (TILE_M, K_pad), w_ref: (K_pad, F_pad),
    scale_ref/shift_ref: (1, F_pad), o_ref: (TILE_M, F_pad)
    """
    y = jnp.dot(x_ref[...], w_ref[...], preferred_element_type=jnp.float32)
    o = y * scale_ref[...] + shift_ref[...]
    # LeakyReLU with positive slope < 1 is just an elementwise max.
    o_ref[...] = jnp.maximum(o, NEG_SLOPE * o)


@functools.partial(
    jax.jit, static_argnames=("stride", "padding", "tile_m", "mxu_dtype"))
def meta_conv_norm_relu(x_nchw, weight, bias, gamma, beta, *, stride, padding,
                        tile_m=512, mxu_dtype=jnp.float32):
    """x_nchw: (N, C, H, W); weight: (F, C, KH, KW) (PyTorch layout).
    Returns (N, F, OH, OW), matching MetaConvNormLayerReLU.forward."""
    del bias  # per-channel conv bias cancels exactly under training-mode BN
    N, C, H, W = x_nchw.shape
    F_out, _, KH, KW = weight.shape
    OH = (H + 2 * padding - KH) // stride + 1
    OW = (W + 2 * padding - KW) // stride + 1
    M = N * OH * OW
    K = KH * KW * C

    # Lane/sublane-aligned padded sizes.
    F_pad = _round_up(F_out, LANE)
    K_pad = _round_up(K, SUBLANE)
    tile_m = max(SUBLANE, min(_round_up(M, SUBLANE), _round_up(tile_m, SUBLANE)))
    M_pad = _round_up(M, tile_m)
    T = M_pad // tile_m

    # --- glue: layout + im2col (pure slicing/reshape, no FLOPs) ---
    x_nhwc = jnp.transpose(x_nchw, (0, 2, 3, 1))                    # N,H,W,C
    x_sp = jnp.pad(x_nhwc,
                   ((0, 0), (padding, padding), (padding, padding), (0, 0)))
    patches = []
    for kh in range(KH):
        for kw in range(KW):
            patches.append(
                x_sp[:, kh:kh + stride * OH:stride,
                     kw:kw + stride * OW:stride, :])
    # patch feature order: (kh, kw, c), kh slowest
    x_mat = jnp.concatenate(patches, axis=-1).reshape(M, K)
    x_mat = jnp.pad(x_mat, ((0, M_pad - M), (0, K_pad - K))).astype(mxu_dtype)

    # weight (F,C,KH,KW) -> (KH,KW,C,F) -> (K,F) -> zero-padded (K_pad, F_pad)
    w_mat = jnp.transpose(weight, (2, 3, 1, 0)).reshape(K, F_out)
    w_mat = jnp.pad(w_mat, ((0, K_pad - K), (0, F_pad - F_out))).astype(mxu_dtype)

    # --- pass 1: per-tile partial (sum, sumsq) over the conv output ---
    stats = pl.pallas_call(
        _stats_kernel,
        out_shape=jax.ShapeDtypeStruct((T * 8, F_pad), jnp.float32),
        grid=(T,),
        in_specs=[
            pl.BlockSpec((tile_m, K_pad), lambda i: (i, 0)),
            pl.BlockSpec((K_pad, F_pad), lambda i: (0, 0)),
        ],
        out_specs=pl.BlockSpec((8, F_pad), lambda i: (i, 0)),
        compiler_params=pltpu.CompilerParams(
            dimension_semantics=("parallel",)),
    )(x_mat, w_mat)

    # --- finalize BN statistics (tiny (F_pad,) vectors; plain XLA) ---
    stats = stats.reshape(T, 8, F_pad)
    sum_y = jnp.sum(stats[:, 0, :], axis=0)
    sum_yy = jnp.sum(stats[:, 1, :], axis=0)
    inv_m = jnp.float32(1.0) / jnp.float32(M)           # true M (ignore pad rows)
    mean = sum_y * inv_m
    var = jnp.maximum(sum_yy * inv_m - mean * mean, 0.0)  # biased variance, >= 0
    inv_std = jax.lax.rsqrt(var + EPS)
    g = jnp.pad(gamma.astype(jnp.float32), (0, F_pad - F_out))
    b = jnp.pad(beta.astype(jnp.float32), (0, F_pad - F_out))
    scale = (inv_std * g).reshape(1, F_pad)
    shift = (b - mean * inv_std * g).reshape(1, F_pad)

    # --- pass 2: apply folded BN scale/shift + LeakyReLU, lane-dense output ---
    out_mat = pl.pallas_call(
        _apply_kernel,
        out_shape=jax.ShapeDtypeStruct((M_pad, F_pad), jnp.float32),
        grid=(T,),
        in_specs=[
            pl.BlockSpec((tile_m, K_pad), lambda i: (i, 0)),
            pl.BlockSpec((K_pad, F_pad), lambda i: (0, 0)),
            pl.BlockSpec((1, F_pad), lambda i: (0, 0)),
            pl.BlockSpec((1, F_pad), lambda i: (0, 0)),
        ],
        out_specs=pl.BlockSpec((tile_m, F_pad), lambda i: (i, 0)),
        compiler_params=pltpu.CompilerParams(
            dimension_semantics=("parallel",)),
    )(x_mat, w_mat, scale, shift)

    # --- glue: strip padding and go back to NCHW ---
    out = out_mat[:M, :F_out].reshape(N, OH, OW, F_out)
    return jnp.transpose(out, (0, 3, 1, 2))


if __name__ == "__main__":
    # Module hyperparameters: input_shape=(2,4,16,16), num_filters=8,
    # kernel_size=3, stride=1, padding=1, use_bias=True, norm='batch_norm'.
    N, C, H, W = 2, 4, 16, 16
    F_out, Ksz = 8, 3
    stride, padding = 1, 1

    key = jax.random.PRNGKey(0)
    kx, kw = jax.random.split(key)
    x = jax.random.normal(kx, (N, C, H, W), dtype=jnp.float32)

    # Xavier-uniform conv weight (nn.init.xavier_uniform_), zero conv bias.
    fan_in = C * Ksz * Ksz
    fan_out = F_out * Ksz * Ksz
    bound = (6.0 / (fan_in + fan_out)) ** 0.5
    weight = jax.random.uniform(kw, (F_out, C, Ksz, Ksz), jnp.float32,
                                -bound, bound)
    bias = jnp.zeros((F_out,), jnp.float32)
    # MetaBatchNormLayer init: weight (gamma) = ones, bias (beta) = zeros.
    gamma = jnp.ones((F_out,), jnp.float32)
    beta = jnp.zeros((F_out,), jnp.float32)

    # tile_m=256 -> 2 M-tiles: exercises the cross-tile two-phase BN reduction.
    out = meta_conv_norm_relu(x, weight, bias, gamma, beta,
                              stride=stride, padding=padding, tile_m=256)
    jax.block_until_ready(out)

    # Pure-JAX reference with identical semantics.
    ref_conv = jax.lax.conv_general_dilated(
        x, weight, window_strides=(stride, stride),
        padding=[(padding, padding), (padding, padding)],
        dimension_numbers=("NCHW", "OIHW", "NCHW"),
    ) + bias.reshape(1, F_out, 1, 1)
    mean = jnp.mean(ref_conv, axis=(0, 2, 3), keepdims=True)
    var = jnp.mean((ref_conv - mean) ** 2, axis=(0, 2, 3), keepdims=True)
    ref_bn = (ref_conv - mean) * jax.lax.rsqrt(var + EPS) \
        * gamma.reshape(1, F_out, 1, 1) + beta.reshape(1, F_out, 1, 1)
    ref = jnp.where(ref_bn >= 0, ref_bn, NEG_SLOPE * ref_bn)

    assert out.shape == (N, F_out, H, W)
    err = float(jnp.max(jnp.abs(out - ref)))
    assert err < 1e-4, f"max abs err {err}"
    print("KERNEL_OK")
</pallas_src>

<mosaic_0001>
module attributes {stable_mosaic.version = 11 : i64} {
  func.func @_stats_kernel(%arg0: i32, %arg1: memref<256x40xf32, #tpu.memory_space<vmem>>, %arg2: memref<40x128xf32, #tpu.memory_space<vmem>>, %arg3: memref<8x128xf32, #tpu.memory_space<vmem>>) attributes {dimension_semantics = [#tpu.dimension_semantics<parallel>], iteration_bounds = array<i64: 2>, scalar_prefetch = 0 : i64, scratch_operands = 0 : i64, tpu.core_type = #tpu.core_type<tc>, window_params = [{transform_indices = @transform_0, window_bounds = array<i64: 256, 40>}, {pipeline_mode = #tpu.pipeline_mode<synchronous>, transform_indices = @transform_1, window_bounds = array<i64: 40, 128>}, {transform_indices = @transform_2, window_bounds = array<i64: 8, 128>}]} {
    %c0 = arith.constant 0 : index
    %c0_0 = arith.constant 0 : index
    %0 = vector.load %arg1[%c0, %c0_0] : memref<256x40xf32, #tpu.memory_space<vmem>>, vector<256x40xf32>
    %c0_1 = arith.constant 0 : index
    %c0_2 = arith.constant 0 : index
    %1 = vector.load %arg2[%c0_1, %c0_2] : memref<40x128xf32, #tpu.memory_space<vmem>>, vector<40x128xf32>
    %cst = arith.constant dense<0.000000e+00> : vector<256x128xf32>
    %2 = tpu.matmul %0, %1, %cst {dimension_numbers = #tpu.dot_dimension_numbers<[1], [0], [0], [1], [0, 0, 1, 1], [], []>} : vector<256x40xf32>, vector<40x128xf32>, vector<256x128xf32> -> vector<256x128xf32>
    %cst_3 = arith.constant dense<0.000000e+00> : vector<128xf32>
    %3 = vector.multi_reduction <add>, %2, %cst_3 [0] : vector<256x128xf32> to vector<128xf32>
    %4 = vector.shape_cast %3 : vector<128xf32> to vector<1x128xf32>
    %5 = arith.mulf %2, %2 : vector<256x128xf32>
    %cst_4 = arith.constant dense<0.000000e+00> : vector<128xf32>
    %6 = vector.multi_reduction <add>, %5, %cst_4 [0] : vector<256x128xf32> to vector<128xf32>
    %7 = vector.shape_cast %6 : vector<128xf32> to vector<1x128xf32>
    %cst_5 = arith.constant 0.000000e+00 : f32
    %8 = vector.broadcast %cst_5 : f32 to vector<6x128xf32>
    %9 = tpu.concatenate %4, %7, %8 in 0 : vector<1x128xf32>, vector<1x128xf32>, vector<6x128xf32> -> vector<8x128xf32>
    %c0_6 = arith.constant 0 : index
    %c0_7 = arith.constant 0 : index
    %10 = vector.load %arg3[%c0_6, %c0_7] : memref<8x128xf32, #tpu.memory_space<vmem>>, vector<8x128xf32>
    tpu.vector_store %arg3[%c0_6, %c0_7], %9 {strides = array<i32>} : memref<8x128xf32, #tpu.memory_space<vmem>>, vector<8x128xf32>,
    return
  }
  func.func @transform_0(%arg0: i32) -> (i32, i32) {
    %c0_i32 = arith.constant 0 : i32
    %c0_i32_0 = arith.constant 0 : i32
    return %arg0, %c0_i32 : i32, i32
  }
  func.func @transform_1(%arg0: i32) -> (i32, i32) {
    %c0_i32 = arith.constant 0 : i32
    %c0_i32_0 = arith.constant 0 : i32
    %c0_i32_1 = arith.constant 0 : i32
    return %c0_i32, %c0_i32_0 : i32, i32
  }
  func.func @transform_2(%arg0: i32) -> (i32, i32) {
    %c0_i32 = arith.constant 0 : i32
    %c0_i32_0 = arith.constant 0 : i32
    return %arg0, %c0_i32 : i32, i32
  }
}

module attributes {stable_mosaic.version = 11 : i64} {
  func.func @_apply_kernel(%arg0: i32, %arg1: memref<256x40xf32, #tpu.memory_space<vmem>>, %arg2: memref<40x128xf32, #tpu.memory_space<vmem>>, %arg3: memref<1x128xf32, #tpu.memory_space<vmem>>, %arg4: memref<1x128xf32, #tpu.memory_space<vmem>>, %arg5: memref<256x128xf32, #tpu.memory_space<vmem>>) attributes {dimension_semantics = [#tpu.dimension_semantics<parallel>], iteration_bounds = array<i64: 2>, scalar_prefetch = 0 : i64, scratch_operands = 0 : i64, tpu.core_type = #tpu.core_type<tc>, window_params = [{transform_indices = @transform_0, window_bounds = array<i64: 256, 40>}, {pipeline_mode = #tpu.pipeline_mode<synchronous>, transform_indices = @transform_1, window_bounds = array<i64: 40, 128>}, {pipeline_mode = #tpu.pipeline_mode<synchronous>, transform_indices = @transform_2, window_bounds = array<i64: 1, 128>}, {pipeline_mode = #tpu.pipeline_mode<synchronous>, transform_indices = @transform_3, window_bounds = array<i64: 1, 128>}, {transform_indices = @transform_4, window_bounds = array<i64: 256, 128>}]} {
    %c0 = arith.constant 0 : index
    %c0_0 = arith.constant 0 : index
    %0 = vector.load %arg1[%c0, %c0_0] : memref<256x40xf32, #tpu.memory_space<vmem>>, vector<256x40xf32>
    %c0_1 = arith.constant 0 : index
    %c0_2 = arith.constant 0 : index
    %1 = vector.load %arg2[%c0_1, %c0_2] : memref<40x128xf32, #tpu.memory_space<vmem>>, vector<40x128xf32>
    %cst = arith.constant dense<0.000000e+00> : vector<256x128xf32>
    %2 = tpu.matmul %0, %1, %cst {dimension_numbers = #tpu.dot_dimension_numbers<[1], [0], [0], [1], [0, 0, 1, 1], [], []>} : vector<256x40xf32>, vector<40x128xf32>, vector<256x128xf32> -> vector<256x128xf32>
    %c0_3 = arith.constant 0 : index
    %c0_4 = arith.constant 0 : index
    %3 = vector.load %arg3[%c0_3, %c0_4] : memref<1x128xf32, #tpu.memory_space<vmem>>, vector<1x128xf32>
    %4 = vector.broadcast %3 : vector<1x128xf32> to vector<256x128xf32>
    %5 = arith.mulf %2, %4 : vector<256x128xf32>
    %c0_5 = arith.constant 0 : index
    %c0_6 = arith.constant 0 : index
    %6 = vector.load %arg4[%c0_5, %c0_6] : memref<1x128xf32, #tpu.memory_space<vmem>>, vector<1x128xf32>
    %7 = vector.broadcast %6 : vector<1x128xf32> to vector<256x128xf32>
    %8 = arith.addf %5, %7 : vector<256x128xf32>
    %cst_7 = arith.constant 0.00999999977 : f32
    %9 = vector.broadcast %cst_7 : f32 to vector<256x128xf32>
    %10 = arith.mulf %9, %8 : vector<256x128xf32>
    %11 = arith.maximumf %8, %10 : vector<256x128xf32>
    %c0_8 = arith.constant 0 : index
    %c0_9 = arith.constant 0 : index
    %12 = vector.load %arg5[%c0_8, %c0_9] : memref<256x128xf32, #tpu.memory_space<vmem>>, vector<256x128xf32>
    tpu.vector_store %arg5[%c0_8, %c0_9], %11 {strides = array<i32>} : memref<256x128xf32, #tpu.memory_space<vmem>>, vector<256x128xf32>,
    return
  }
  func.func @transform_0(%arg0: i32) -> (i32, i32) {
    %c0_i32 = arith.constant 0 : i32
    %c0_i32_0 = arith.constant 0 : i32
    return %arg0, %c0_i32 : i32, i32
  }
  func.func @transform_1(%arg0: i32) -> (i32, i32) {
    %c0_i32 = arith.constant 0 : i32
    %c0_i32_0 = arith.constant 0 : i32
    %c0_i32_1 = arith.constant 0 : i32
    return %c0_i32, %c0_i32_0 : i32, i32
  }
  func.func @transform_2(%arg0: i32) -> (i32, i32) {
    %c0_i32 = arith.constant 0 : i32
    %c0_i32_0 = arith.constant 0 : i32
    %c0_i32_1 = arith.constant 0 : i32
    return %c0_i32, %c0_i32_0 : i32, i32
  }
  func.func @transform_3(%arg0: i32) -> (i32, i32) {
    %c0_i32 = arith.constant 0 : i32
    %c0_i32_0 = arith.constant 0 : i32
    %c0_i32_1 = arith.constant 0 : i32
    return %c0_i32, %c0_i32_0 : i32, i32
  }
  func.func @transform_4(%arg0: i32) -> (i32, i32) {
    %c0_i32 = arith.constant 0 : i32
    %c0_i32_0 = arith.constant 0 : i32
    return %arg0, %c0_i32 : i32, i32
  }
}

</mosaic_0001>

<bundles_post_ra>
// kernel: meta_conv_norm_relu.3
= control target key start
LH: loop header
LB: loop body
LE: loop exit
PB: predicated region body
PF: predicated region fallthrough
CT: control target
= control target key end

     0   :  { %s773_s15 = smov 0   ;;  %s986_s0 = inlined_call_operand.vmem [shape: f32[512,40], index: 0, kind: input, shape index: {}]   ;;  %s987_s1 = inlined_call_operand.vmem [shape: f32[40,128], index: 1, kind: input, shape index: {}]   ;;  %s988_s2 = inlined_call_operand.vmem [shape: f32[1,128], index: 2, kind: input, shape index: {}]   ;;  %s989_s3 = inlined_call_operand.vmem [shape: f32[1,128], index: 3, kind: input, shape index: {}]   ;;  %s990_s4 = inlined_call_operand.vmem [shape: f32[512,128], index: 4, kind: output, shape index: {}]  }
   0x1 LB: > { %s672_s16 = sadd.s32 4294967295, %s746_s15   ;;  %p676_p0 = scmp.ge.s32.totalorder %s746_s15, 1  ;;  %s746_s15 = sphi %s773_s15, %s14_s15  }
   0x2   : > { %p163_p1 = scmp.lt.s32.totalorder %s746_s15, 3 }
   0x4   : > { %p164_p2 = pnand %p676_p0, %p163_p1 }
   0x5   : > { %s677_s21 = sshll.u32 (!%p164_p2), %s672_s16, 5 }
   0x6   : > { %167 = sbr.rel (%p164_p2) target bundleno = 219 (0xdb), region = 36  ;;  %p190_p3 = scmp.lt.s32.totalorder (!%p164_p2), %s677_s21, 63 }
   0xb   : > { %v237_v0 = vld [vmem:[%s987_s1 + $0x20] sm:$0xff]  ;;  %v236_v1 = vld [vmem:[%s987_s1 + $0x18] sm:$0xff]  ;;  %v235_v2 = vld [vmem:[%s987_s1 + $0x10] sm:$0xff]  ;;  %s992_s21 = smov (!%p190_p3, %s677_s21), 63  ;;  %vm238_vm0 = vcmask 326656  }
   0xc   : > { %716 = vmatpush.msra.mxu2 %v237_v0  ;;  %717 = vmatpush.msra.mxu3 %v237_v0  ;;  %v234_v3 = vld [vmem:[%s987_s1 + $0x8] sm:$0xff]  ;;  %s678_s26 = sshll.u32 %s992_s21, 3  ;;  %v233_v4 = vld [vmem:[%s987_s1] sm:$0xff] }
   0xd   : > { %346 = vmatpush.msra.mxu0 %v237_v0  ;;  %715 = vmatpush.msra.mxu1 %v237_v0  ;;  %s804_s5 = scalar_lea.vmem %s986_s0, %s678_s26  ;;  %v873_v37 = vld [vmem:[%s988_s2] ss:$0 sm:$0xff]  ;;  %s891_s12 = scalar_lea.vmem %s990_s4, %s678_s26 }
   0xe   : > { %719 = vmatpush.msra.mxu2 %v236_v1  ;;  %720 = vmatpush.msra.mxu3 %v236_v1  ;;  %v217_v5 = vld [vmem:[%s804_s5 + $0x80] sm:$0xff]  ;;  %v218_v9 = vld [vmem:[%s804_s5 + $0x88] sm:$0xff]  ;;  %v219_v13 = vld [vmem:[%s804_s5 + $0x90] sm:$0xff] }
   0xf   : > { %347 = vmatpush.msra.mxu0 %v236_v1  ;;  %718 = vmatpush.msra.mxu1 %v236_v1  ;;  %v225_v6 = vld [vmem:[%s804_s5 + $0xc0] sm:$0xff]  ;;  %v226_v10 = vld [vmem:[%s804_s5 + $0xc8] sm:$0xff]  ;;  %v227_v14 = vld [vmem:[%s804_s5 + $0xd0] sm:$0xff] }
  0x10   : > { %722 = vmatpush.msra.mxu2 %v235_v2  ;;  %723 = vmatpush.msra.mxu3 %v235_v2  ;;  %v201_v7 = vld [vmem:[%s804_s5] sm:$0xff]  ;;  %v202_v11 = vld [vmem:[%s804_s5 + $0x8] sm:$0xff]  ;;  %v203_v15 = vld [vmem:[%s804_s5 + $0x10] sm:$0xff] }
  0x11   : > { %348 = vmatpush.msra.mxu0 %v235_v2  ;;  %721 = vmatpush.msra.mxu1 %v235_v2  ;;  %v209_v8 = vld [vmem:[%s804_s5 + $0x40] sm:$0xff]  ;;  %v210_v12 = vld [vmem:[%s804_s5 + $0x48] sm:$0xff]  ;;  %v211_v16 = vld [vmem:[%s804_s5 + $0x50] sm:$0xff] }
  0x12   : > { %725 = vmatpush.msra.mxu2 %v234_v3  ;;  %726 = vmatpush.msra.mxu3 %v234_v3  ;;  %v220_v17 = vld [vmem:[%s804_s5 + $0x98] sm:$0xff]  ;;  %v221_v21 = vld [vmem:[%s804_s5 + $0xa0] sm:$0xff]  ;;  %v222_v25 = vld [vmem:[%s804_s5 + $0xa8] sm:$0xff] }
  0x13   : > { %349 = vmatpush.msra.mxu0 %v234_v3  ;;  %724 = vmatpush.msra.mxu1 %v234_v3  ;;  %v228_v18 = vld [vmem:[%s804_s5 + $0xd8] sm:$0xff]  ;;  %v229_v22 = vld [vmem:[%s804_s5 + $0xe0] sm:$0xff]  ;;  %v230_v26 = vld [vmem:[%s804_s5 + $0xe8] sm:$0xff] }
  0x14   : > { %728 = vmatpush.msra.mxu2 %v233_v4  ;;  %729 = vmatpush.msra.mxu3 %v233_v4  ;;  %v204_v19 = vld [vmem:[%s804_s5 + $0x18] sm:$0xff]  ;;  %v205_v23 = vld [vmem:[%s804_s5 + $0x20] sm:$0xff]  ;;  %v206_v27 = vld [vmem:[%s804_s5 + $0x28] sm:$0xff] }
  0x15   : > { %697 = vmatmul.msk.f32.vlgmr.msra.gmra.mxu2 %vm238_vm0, %v217_v5  ;;  %705 = vmatmul.msk.f32.vlgmr.msra.gmra.mxu3 %vm238_vm0, %v225_v6  ;;  %v212_v20 = vld [vmem:[%s804_s5 + $0x58] sm:$0xff]  ;;  %v213_v24 = vld [vmem:[%s804_s5 + $0x60] sm:$0xff]  ;;  %v214_v28 = vld [vmem:[%s804_s5 + $0x68] sm:$0xff] }
  0x16   : > { %350 = vmatpush.msra.mxu0 %v233_v4  ;;  %727 = vmatpush.msra.mxu1 %v233_v4  ;;  %v223_v29 = vld [vmem:[%s804_s5 + $0xb0] sm:$0xff]  ;;  %v224_v33 = vld [vmem:[%s804_s5 + $0xb8] sm:$0xff]  ;;  %v878_v38 = vld [vmem:[%s989_s3] ss:$0 sm:$0xff] }
  0x17   : > { %681 = vmatmul.msk.f32.vlgmr.msra.gmra.mxu0 %vm238_vm0, %v201_v7  ;;  %689 = vmatmul.msk.f32.vlgmr.msra.gmra.mxu1 %vm238_vm0, %v209_v8  ;;  %v231_v30 = vld [vmem:[%s804_s5 + $0xf0] sm:$0xff]  ;;  %v232_v34 = vld [vmem:[%s804_s5 + $0xf8] sm:$0xff] }
  0x18   : > { %v207_v31 = vld [vmem:[%s804_s5 + $0x30] sm:$0xff]  ;;  %v208_v35 = vld [vmem:[%s804_s5 + $0x38] sm:$0xff] }
  0x19   : > { %v215_v32 = vld [vmem:[%s804_s5 + $0x70] sm:$0xff]  ;;  %v216_v36 = vld [vmem:[%s804_s5 + $0x78] sm:$0xff] }
  0x1d   : > { %698 = vmatmul.msk.f32.gmra.mxu2 %vm238_vm0, %v218_v9  ;;  %706 = vmatmul.msk.f32.gmra.mxu3 %vm238_vm0, %v226_v10 }
  0x1f   : > { %682 = vmatmul.msk.f32.gmra.mxu0 %vm238_vm0, %v202_v11  ;;  %690 = vmatmul.msk.f32.gmra.mxu1 %vm238_vm0, %v210_v12 }
  0x25   : > { %699 = vmatmul.msk.f32.gmra.mxu2 %vm238_vm0, %v219_v13  ;;  %707 = vmatmul.msk.f32.gmra.mxu3 %vm238_vm0, %v227_v14 }
  0x27   : > { %683 = vmatmul.msk.f32.gmra.mxu0 %vm238_vm0, %v203_v15  ;;  %691 = vmatmul.msk.f32.gmra.mxu1 %vm238_vm0, %v211_v16 }
  0x2d   : > { %700 = vmatmul.msk.f32.gmra.mxu2 %vm238_vm0, %v220_v17  ;;  %708 = vmatmul.msk.f32.gmra.mxu3 %vm238_vm0, %v228_v18 }
  0x2f   : > { %684 = vmatmul.msk.f32.gmra.mxu0 %vm238_vm0, %v204_v19  ;;  %692 = vmatmul.msk.f32.gmra.mxu1 %vm238_vm0, %v212_v20 }
  0x35   : > { %701 = vmatmul.msk.f32.gmra.mxu2 %vm238_vm0, %v221_v21  ;;  %709 = vmatmul.msk.f32.gmra.mxu3 %vm238_vm0, %v229_v22 }
  0x37   : > { %685 = vmatmul.msk.f32.gmra.mxu0 %vm238_vm0, %v205_v23  ;;  %693 = vmatmul.msk.f32.gmra.mxu1 %vm238_vm0, %v213_v24 }
  0x3d   : > { %702 = vmatmul.msk.f32.gmra.mxu2 %vm238_vm0, %v222_v25  ;;  %710 = vmatmul.msk.f32.gmra.mxu3 %vm238_vm0, %v230_v26 }
  0x3f   : > { %686 = vmatmul.msk.f32.gmra.mxu0 %vm238_vm0, %v206_v27  ;;  %694 = vmatmul.msk.f32.gmra.mxu1 %vm238_vm0, %v214_v28 }
  0x45   : > { %703 = vmatmul.msk.f32.gmra.mxu2 %vm238_vm0, %v223_v29  ;;  %711 = vmatmul.msk.f32.gmra.mxu3 %vm238_vm0, %v231_v30 }
  0x47   : > { %687 = vmatmul.msk.f32.gmra.mxu0 %vm238_vm0, %v207_v31  ;;  %695 = vmatmul.msk.f32.gmra.mxu1 %vm238_vm0, %v215_v32 }
  0x4d   : > { %704 = vmatmul.msk.f32.gmra.mxu2 %vm238_vm0, %v224_v33  ;;  %712 = vmatmul.msk.f32.gmra.mxu3 %vm238_vm0, %v232_v34 }
  0x4f   : > { %688 = vmatmul.msk.f32.gmra.mxu0 %vm238_vm0, %v208_v35  ;;  %696 = vmatmul.msk.f32.gmra.mxu1 %vm238_vm0, %v216_v36 }
  0x94   : > { %v352_v39 = vpop.f32.mrf.mxu0  ;;  %v376_v40 = vpop.f32.mrf.mxu1 }
  0x95   : > { %v452_v41 = vmul.f32 %v873_v37, %v352_v39  ;;  %v460_v42 = vmul.f32 %v873_v37, %v376_v40 }
  0x97   : > { %v488_v43 = vadd.f32 %v878_v38, %v452_v41  ;;  %v496_v44 = vadd.f32 %v878_v38, %v460_v42 }
  0x98   : > { %v400_v45 = vpop.f32.mrf.mxu2  ;;  %v424_v46 = vpop.f32.mrf.mxu3 }
  0x99   : > { %v520_v47 = vmul.f32 0.01, %v488_v43  ;;  %v528_v48 = vmul.f32 0.01, %v496_v44  ;;  %v468_v49 = vmul.f32 %v873_v37, %v400_v45  ;;  %v476_v50 = vmul.f32 %v873_v37, %v424_v46 }
  0x9b   : > { %v552_v51 = vmax.f32 %v488_v43, %v520_v47  ;;  %v560_v52 = vmax.f32 %v496_v44, %v528_v48  ;;  %v504_v53 = vadd.f32 %v878_v38, %v468_v49  ;;  %v512_v54 = vadd.f32 %v878_v38, %v476_v50 }
  0x9c   : > { %v355_v55 = vpop.f32.mrf.mxu0  ;;  %v379_v56 = vpop.f32.mrf.mxu1 }
  0x9d   : > { %584 = vst [vmem:[%s891_s12] sm:$0xff] %v552_v51  ;;  %v536_v57 = vmul.f32 0.01, %v504_v53  ;;  %v544_v58 = vmul.f32 0.01, %v512_v54  ;;  %v453_v59 = vmul.f32 %v873_v37, %v355_v55  ;;  %v461_v60 = vmul.f32 %v873_v37, %v379_v56 }
  0x9e   : > { %592 = vst [vmem:[%s891_s12 + $0x40] sm:$0xff] %v560_v52 }
  0x9f   : > { %v568_v61 = vmax.f32 %v504_v53, %v536_v57  ;;  %v576_v62 = vmax.f32 %v512_v54, %v544_v58  ;;  %v489_v63 = vadd.f32 %v878_v38, %v453_v59  ;;  %v497_v0 = vadd.f32 %v878_v38, %v461_v60 }
  0xa0   : > { %v403_v1 = vpop.f32.mrf.mxu2  ;;  %v427_v2 = vpop.f32.mrf.mxu3 }
  0xa1   : > { %600 = vst [vmem:[%s891_s12 + $0x80] sm:$0xff] %v568_v61  ;;  %v521_v3 = vmul.f32 0.01, %v489_v63  ;;  %v529_v4 = vmul.f32 0.01, %v497_v0  ;;  %v469_v5 = vmul.f32 %v873_v37, %v403_v1  ;;  %v477_v6 = vmul.f32 %v873_v37, %v427_v2 }
  0xa2   : > { %608 = vst [vmem:[%s891_s12 + $0xc0] sm:$0xff] %v576_v62 }
  0xa3   : > { %v553_v7 = vmax.f32 %v489_v63, %v521_v3  ;;  %v561_v8 = vmax.f32 %v497_v0, %v529_v4  ;;  %v505_v9 = vadd.f32 %v878_v38, %v469_v5  ;;  %v513_v10 = vadd.f32 %v878_v38, %v477_v6 }
  0xa4   : > { %v358_v11 = vpop.f32.mrf.mxu0  ;;  %v382_v12 = vpop.f32.mrf.mxu1 }
  0xa5   : > { %585 = vst [vmem:[%s891_s12 + $0x8] sm:$0xff] %v553_v7  ;;  %v537_v13 = vmul.f32 0.01, %v505_v9  ;;  %v545_v14 = vmul.f32 0.01, %v513_v10  ;;  %v454_v15 = vmul.f32 %v873_v37, %v358_v11  ;;  %v462_v16 = vmul.f32 %v873_v37, %v382_v12 }
  0xa6   : > { %593 = vst [vmem:[%s891_s12 + $0x48] sm:$0xff] %v561_v8 }
  0xa7   : > { %v569_v17 = vmax.f32 %v505_v9, %v537_v13  ;;  %v577_v18 = vmax.f32 %v513_v10, %v545_v14  ;;  %v490_v19 = vadd.f32 %v878_v38, %v454_v15  ;;  %v498_v20 = vadd.f32 %v878_v38, %v462_v16 }
  0xa8   : > { %v406_v21 = vpop.f32.mrf.mxu2  ;;  %v430_v22 = vpop.f32.mrf.mxu3 }
  0xa9   : > { %601 = vst [vmem:[%s891_s12 + $0x88] sm:$0xff] %v569_v17  ;;  %v522_v23 = vmul.f32 0.01, %v490_v19  ;;  %v530_v24 = vmul.f32 0.01, %v498_v20  ;;  %v470_v25 = vmul.f32 %v873_v37, %v406_v21  ;;  %v478_v26 = vmul.f32 %v873_v37, %v430_v22 }
  0xaa   : > { %609 = vst [vmem:[%s891_s12 + $0xc8] sm:$0xff] %v577_v18 }
  0xab   : > { %v554_v27 = vmax.f32 %v490_v19, %v522_v23  ;;  %v562_v28 = vmax.f32 %v498_v20, %v530_v24  ;;  %v506_v29 = vadd.f32 %v878_v38, %v470_v25  ;;  %v514_v30 = vadd.f32 %v878_v38, %v478_v26 }
  0xac   : > { %v361_v31 = vpop.f32.mrf.mxu0  ;;  %v385_v32 = vpop.f32.mrf.mxu1 }
  0xad   : > { %586 = vst [vmem:[%s891_s12 + $0x10] sm:$0xff] %v554_v27  ;;  %v538_v33 = vmul.f32 0.01, %v506_v29  ;;  %v546_v34 = vmul.f32 0.01, %v514_v30  ;;  %v455_v35 = vmul.f32 %v873_v37, %v361_v31  ;;  %v463_v36 = vmul.f32 %v873_v37, %v385_v32 }
  0xae   : > { %594 = vst [vmem:[%s891_s12 + $0x50] sm:$0xff] %v562_v28 }
  0xaf   : > { %v570_v39 = vmax.f32 %v506_v29, %v538_v33  ;;  %v578_v40 = vmax.f32 %v514_v30, %v546_v34  ;;  %v491_v41 = vadd.f32 %v878_v38, %v455_v35  ;;  %v499_v42 = vadd.f32 %v878_v38, %v463_v36 }
  0xb0   : > { %v409_v43 = vpop.f32.mrf.mxu2  ;;  %v433_v44 = vpop.f32.mrf.mxu3 }
  0xb1   : > { %602 = vst [vmem:[%s891_s12 + $0x90] sm:$0xff] %v570_v39  ;;  %v523_v45 = vmul.f32 0.01, %v491_v41  ;;  %v531_v46 = vmul.f32 0.01, %v499_v42  ;;  %v471_v47 = vmul.f32 %v873_v37, %v409_v43  ;;  %v479_v48 = vmul.f32 %v873_v37, %v433_v44 }
  0xb2   : > { %610 = vst [vmem:[%s891_s12 + $0xd0] sm:$0xff] %v578_v40 }
  0xb3   : > { %v555_v49 = vmax.f32 %v491_v41, %v523_v45  ;;  %v563_v50 = vmax.f32 %v499_v42, %v531_v46  ;;  %v507_v51 = vadd.f32 %v878_v38, %v471_v47  ;;  %v515_v52 = vadd.f32 %v878_v38, %v479_v48 }
  0xb4   : > { %v364_v53 = vpop.f32.mrf.mxu0  ;;  %v388_v54 = vpop.f32.mrf.mxu1 }
  0xb5   : > { %587 = vst [vmem:[%s891_s12 + $0x18] sm:$0xff] %v555_v49  ;;  %v539_v55 = vmul.f32 0.01, %v507_v51  ;;  %v547_v56 = vmul.f32 0.01, %v515_v52  ;;  %v456_v57 = vmul.f32 %v873_v37, %v364_v53  ;;  %v464_v58 = vmul.f32 %v873_v37, %v388_v54 }
  0xb6   : > { %595 = vst [vmem:[%s891_s12 + $0x58] sm:$0xff] %v563_v50 }
  0xb7   : > { %v571_v59 = vmax.f32 %v507_v51, %v539_v55  ;;  %v579_v60 = vmax.f32 %v515_v52, %v547_v56  ;;  %v492_v61 = vadd.f32 %v878_v38, %v456_v57  ;;  %v500_v62 = vadd.f32 %v878_v38, %v464_v58 }
  0xb8   : > { %v412_v63 = vpop.f32.mrf.mxu2  ;;  %v436_v0 = vpop.f32.mrf.mxu3 }
  0xb9   : > { %603 = vst [vmem:[%s891_s12 + $0x98] sm:$0xff] %v571_v59  ;;  %v524_v1 = vmul.f32 0.01, %v492_v61  ;;  %v532_v2 = vmul.f32 0.01, %v500_v62  ;;  %v472_v3 = vmul.f32 %v873_v37, %v412_v63  ;;  %v480_v4 = vmul.f32 %v873_v37, %v436_v0 }
  0xba   : > { %611 = vst [vmem:[%s891_s12 + $0xd8] sm:$0xff] %v579_v60 }
  0xbb   : > { %v556_v5 = vmax.f32 %v492_v61, %v524_v1  ;;  %v564_v6 = vmax.f32 %v500_v62, %v532_v2  ;;  %v508_v7 = vadd.f32 %v878_v38, %v472_v3  ;;  %v516_v8 = vadd.f32 %v878_v38, %v480_v4 }
  0xbc   : > { %v367_v9 = vpop.f32.mrf.mxu0  ;;  %v391_v10 = vpop.f32.mrf.mxu1 }
  0xbd   : > { %588 = vst [vmem:[%s891_s12 + $0x20] sm:$0xff] %v556_v5  ;;  %v540_v11 = vmul.f32 0.01, %v508_v7  ;;  %v548_v12 = vmul.f32 0.01, %v516_v8  ;;  %v457_v13 = vmul.f32 %v873_v37, %v367_v9  ;;  %v465_v14 = vmul.f32 %v873_v37, %v391_v10 }
  0xbe   : > { %596 = vst [vmem:[%s891_s12 + $0x60] sm:$0xff] %v564_v6 }
  0xbf   : > { %v572_v15 = vmax.f32 %v508_v7, %v540_v11  ;;  %v580_v16 = vmax.f32 %v516_v8, %v548_v12  ;;  %v493_v17 = vadd.f32 %v878_v38, %v457_v13  ;;  %v501_v18 = vadd.f32 %v878_v38, %v465_v14 }
  0xc0   : > { %v415_v19 = vpop.f32.mrf.mxu2  ;;  %v439_v20 = vpop.f32.mrf.mxu3 }
  0xc1   : > { %604 = vst [vmem:[%s891_s12 + $0xa0] sm:$0xff] %v572_v15  ;;  %v525_v21 = vmul.f32 0.01, %v493_v17  ;;  %v533_v22 = vmul.f32 0.01, %v501_v18  ;;  %v473_v23 = vmul.f32 %v873_v37, %v415_v19  ;;  %v481_v24 = vmul.f32 %v873_v37, %v439_v20 }
  0xc2   : > { %612 = vst [vmem:[%s891_s12 + $0xe0] sm:$0xff] %v580_v16 }
  0xc3   : > { %v557_v25 = vmax.f32 %v493_v17, %v525_v21  ;;  %v565_v26 = vmax.f32 %v501_v18, %v533_v22  ;;  %v509_v27 = vadd.f32 %v878_v38, %v473_v23  ;;  %v517_v28 = vadd.f32 %v878_v38, %v481_v24 }
  0xc4   : > { %v370_v29 = vpop.f32.mrf.mxu0  ;;  %v394_v30 = vpop.f32.mrf.mxu1 }
  0xc5   : > { %589 = vst [vmem:[%s891_s12 + $0x28] sm:$0xff] %v557_v25  ;;  %v541_v31 = vmul.f32 0.01, %v509_v27  ;;  %v549_v32 = vmul.f32 0.01, %v517_v28  ;;  %v458_v33 = vmul.f32 %v873_v37, %v370_v29  ;;  %v466_v34 = vmul.f32 %v873_v37, %v394_v30 }
  0xc6   : > { %597 = vst [vmem:[%s891_s12 + $0x68] sm:$0xff] %v565_v26 }
  0xc7   : > { %v573_v35 = vmax.f32 %v509_v27, %v541_v31  ;;  %v581_v36 = vmax.f32 %v517_v28, %v549_v32  ;;  %v494_v39 = vadd.f32 %v878_v38, %v458_v33  ;;  %v502_v40 = vadd.f32 %v878_v38, %v466_v34 }
  0xc8   : > { %v418_v41 = vpop.f32.mrf.mxu2  ;;  %v442_v42 = vpop.f32.mrf.mxu3 }
  0xc9   : > { %605 = vst [vmem:[%s891_s12 + $0xa8] sm:$0xff] %v573_v35  ;;  %v526_v43 = vmul.f32 0.01, %v494_v39  ;;  %v534_v44 = vmul.f32 0.01, %v502_v40  ;;  %v474_v45 = vmul.f32 %v873_v37, %v418_v41  ;;  %v482_v46 = vmul.f32 %v873_v37, %v442_v42 }
  0xca   : > { %613 = vst [vmem:[%s891_s12 + $0xe8] sm:$0xff] %v581_v36 }
  0xcb   : > { %v558_v47 = vmax.f32 %v494_v39, %v526_v43  ;;  %v566_v48 = vmax.f32 %v502_v40, %v534_v44  ;;  %v510_v49 = vadd.f32 %v878_v38, %v474_v45  ;;  %v518_v50 = vadd.f32 %v878_v38, %v482_v46 }
  0xcc   : > { %v373_v51 = vpop.f32.mrf.mxu0  ;;  %v397_v52 = vpop.f32.mrf.mxu1 }
  0xcd   : > { %590 = vst [vmem:[%s891_s12 + $0x30] sm:$0xff] %v558_v47  ;;  %v542_v53 = vmul.f32 0.01, %v510_v49  ;;  %v550_v54 = vmul.f32 0.01, %v518_v50  ;;  %v459_v55 = vmul.f32 %v873_v37, %v373_v51  ;;  %v467_v56 = vmul.f32 %v873_v37, %v397_v52 }
  0xce   : > { %598 = vst [vmem:[%s891_s12 + $0x70] sm:$0xff] %v566_v48 }
  0xcf   : > { %v574_v57 = vmax.f32 %v510_v49, %v542_v53  ;;  %v582_v58 = vmax.f32 %v518_v50, %v550_v54  ;;  %v495_v59 = vadd.f32 %v878_v38, %v459_v55  ;;  %v503_v60 = vadd.f32 %v878_v38, %v467_v56 }
  0xd0   : > { %v421_v61 = vpop.f32.mrf.mxu2  ;;  %v445_v62 = vpop.f32.mrf.mxu3 }
  0xd1   : > { %606 = vst [vmem:[%s891_s12 + $0xb0] sm:$0xff] %v574_v57  ;;  %v527_v63 = vmul.f32 0.01, %v495_v59  ;;  %v535_v0 = vmul.f32 0.01, %v503_v60  ;;  %v475_v1 = vmul.f32 %v873_v37, %v421_v61  ;;  %v483_v2 = vmul.f32 %v873_v37, %v445_v62 }
  0xd2   : > { %614 = vst [vmem:[%s891_s12 + $0xf0] sm:$0xff] %v582_v58 }
  0xd3   : > { %v559_v3 = vmax.f32 %v495_v59, %v527_v63  ;;  %v567_v4 = vmax.f32 %v503_v60, %v535_v0  ;;  %v511_v5 = vadd.f32 %v878_v38, %v475_v1  ;;  %v519_v6 = vadd.f32 %v878_v38, %v483_v2 }
  0xd5   : > { %591 = vst [vmem:[%s891_s12 + $0x38] sm:$0xff] %v559_v3  ;;  %v543_v7 = vmul.f32 0.01, %v511_v5  ;;  %v551_v8 = vmul.f32 0.01, %v519_v6 }
  0xd6   : > { %599 = vst [vmem:[%s891_s12 + $0x78] sm:$0xff] %v567_v4 }
  0xd7   : > { %v575_v9 = vmax.f32 %v511_v5, %v543_v7  ;;  %v583_v10 = vmax.f32 %v519_v6, %v551_v8 }
  0xd9   : > { %607 = vst [vmem:[%s891_s12 + $0xb8] sm:$0xff] %v575_v9 }
  0xda   : > { %615 = vst [vmem:[%s891_s12 + $0xf8] sm:$0xff] %v583_v10 }
  0xdb PF: > { %s14_s15 = sadd.s32 1, %s746_s15  }
  0xdc   : > { %p11_p4 = scmp.ge.s32.totalorder %s14_s15, 4  }
  0xde   :  { %13 = sbr.rel (!%p11_p4) target bundleno = 1 (0x1), region = 66 }

// kernel: meta_conv_norm_relu.2
= control target key start
LH: loop header
LB: loop body
LE: loop exit
PB: predicated region body
PF: predicated region fallthrough
CT: control target
= control target key end

     0   :  { %s643_s9 = smov 0   ;;  %s786_s0 = inlined_call_operand.vmem [shape: f32[512,40], index: 0, kind: input, shape index: {}]   ;;  %s787_s1 = inlined_call_operand.vmem [shape: f32[40,128], index: 1, kind: input, shape index: {}]   ;;  %s788_s2 = inlined_call_operand.vmem [shape: f32[16,128], index: 2, kind: output, shape index: {}]  }
   0x1 LB: > { %s649_s10 = sadd.s32 4294967295, %s626_s9   ;;  %p559_p0 = scmp.ge.s32.totalorder %s626_s9, 1  ;;  %s626_s9 = sphi %s643_s9, %s12_s9  }
   0x2   : > { %p113_p1 = scmp.lt.s32.totalorder %s626_s9, 3 }
   0x4   : > { %p114_p2 = pnand %p559_p0, %p113_p1 }
   0x5   : > { %s560_s15 = sshll.u32 (!%p114_p2), %s649_s10, 5  ;;  %p140_p4 = scmp.lt.s32.totalorder (!%p114_p2), %s649_s10, 1 }
   0x6   : > { %117 = sbr.rel (%p114_p2) target bundleno = 270 (0x10e), region = 28  ;;  %p135_p3 = scmp.lt.s32.totalorder (!%p114_p2), %s560_s15, 63 }
   0xb   : > { %v180_v0 = vld [vmem:[%s787_s1 + $0x20] sm:$0xff]  ;;  %v179_v1 = vld [vmem:[%s787_s1 + $0x18] sm:$0xff]  ;;  %v178_v2 = vld [vmem:[%s787_s1 + $0x10] sm:$0xff]  ;;  %s790_s15 = smov (!%p135_p3, %s560_s15), 63  ;;  %vm181_vm0 = vcmask 326656   ;;  %s792_s10 = smov (!%p140_p4, %s649_s10), 1 }
   0xc   : > { %289 = vmatpush.msra.mxu0 %v180_v0  ;;  %597 = vmatpush.msra.mxu1 %v180_v0  ;;  %v177_v3 = vld [vmem:[%s787_s1 + $0x8] sm:$0xff]  ;;  %s561_s20 = sshll.u32 %s790_s15, 3  ;;  %v176_v4 = vld [vmem:[%s787_s1] sm:$0xff]  ;;  %s562_s26 = sshll.u32 %s792_s10, 3  ;;  %vm497_vm1 = vcmask 1040384   ;;  %vm499_vm2 = vcmask 1041408  }
   0xd   : > { %598 = vmatpush.msra.mxu2 %v180_v0  ;;  %599 = vmatpush.msra.mxu3 %v180_v0  ;;  %s672_s25 = scalar_lea.vmem %s786_s0, %s561_s20  ;;  %s143_s29 = scalar_lea.vmem %s788_s2, %s562_s26 }
   0xe   : > { %290 = vmatpush.msra.mxu0 %v179_v1  ;;  %600 = vmatpush.msra.mxu1 %v179_v1  ;;  %v144_v5 = vld [vmem:[%s672_s25] sm:$0xff]  ;;  %v145_v8 = vld [vmem:[%s672_s25 + $0x8] sm:$0xff]  ;;  %v146_v12 = vld [vmem:[%s672_s25 + $0x10] sm:$0xff] }
   0xf   : > { %601 = vmatpush.msra.mxu2 %v179_v1  ;;  %602 = vmatpush.msra.mxu3 %v179_v1  ;;  %v152_v6 = vld [vmem:[%s672_s25 + $0x40] sm:$0xff]  ;;  %v153_v9 = vld [vmem:[%s672_s25 + $0x48] sm:$0xff]  ;;  %v154_v13 = vld [vmem:[%s672_s25 + $0x50] sm:$0xff] }
  0x10   : > { %291 = vmatpush.msra.mxu0 %v178_v2  ;;  %603 = vmatpush.msra.mxu1 %v178_v2  ;;  %v160_v7 = vld [vmem:[%s672_s25 + $0x80] sm:$0xff]  ;;  %v161_v10 = vld [vmem:[%s672_s25 + $0x88] sm:$0xff]  ;;  %v162_v14 = vld [vmem:[%s672_s25 + $0x90] sm:$0xff] }
  0x11   : > { %604 = vmatpush.msra.mxu2 %v178_v2  ;;  %605 = vmatpush.msra.mxu3 %v178_v2  ;;  %v168_v11 = vld [vmem:[%s672_s25 + $0xc0] sm:$0xff]  ;;  %v169_v15 = vld [vmem:[%s672_s25 + $0xc8] sm:$0xff]  ;;  %v147_v16 = vld [vmem:[%s672_s25 + $0x18] sm:$0xff] }
  0x12   : > { %292 = vmatpush.msra.mxu0 %v177_v3  ;;  %606 = vmatpush.msra.mxu1 %v177_v3  ;;  %v155_v17 = vld [vmem:[%s672_s25 + $0x58] sm:$0xff]  ;;  %v170_v19 = vld [vmem:[%s672_s25 + $0xd0] sm:$0xff]  ;;  %v148_v20 = vld [vmem:[%s672_s25 + $0x20] sm:$0xff] }
  0x13   : > { %607 = vmatpush.msra.mxu2 %v177_v3  ;;  %608 = vmatpush.msra.mxu3 %v177_v3  ;;  %v163_v18 = vld [vmem:[%s672_s25 + $0x98] sm:$0xff]  ;;  %v156_v21 = vld [vmem:[%s672_s25 + $0x60] sm:$0xff]  ;;  %v149_v24 = vld [vmem:[%s672_s25 + $0x28] sm:$0xff] }
  0x14   : > { %293 = vmatpush.msra.mxu0 %v176_v4  ;;  %609 = vmatpush.msra.mxu1 %v176_v4  ;;  %v171_v22 = vld [vmem:[%s672_s25 + $0xd8] sm:$0xff]  ;;  %v164_v23 = vld [vmem:[%s672_s25 + $0xa0] sm:$0xff]  ;;  %v157_v25 = vld [vmem:[%s672_s25 + $0x68] sm:$0xff] }
  0x15   : > { %563 = vmatmul.msk.f32.vlgmr.msra.gmra.mxu0 %vm181_vm0, %v144_v5  ;;  %571 = vmatmul.msk.f32.vlgmr.msra.gmra.mxu1 %vm181_vm0, %v152_v6  ;;  %v172_v26 = vld [vmem:[%s672_s25 + $0xe0] sm:$0xff]  ;;  %v165_v27 = vld [vmem:[%s672_s25 + $0xa8] sm:$0xff]  ;;  %v150_v28 = vld [vmem:[%s672_s25 + $0x30] sm:$0xff] }
  0x16   : > { %610 = vmatpush.msra.mxu2 %v176_v4  ;;  %611 = vmatpush.msra.mxu3 %v176_v4  ;;  %v158_v29 = vld [vmem:[%s672_s25 + $0x70] sm:$0xff]  ;;  %v173_v30 = vld [vmem:[%s672_s25 + $0xe8] sm:$0xff]  ;;  %v151_v32 = vld [vmem:[%s672_s25 + $0x38] sm:$0xff] }
  0x17   : > { %579 = vmatmul.msk.f32.vlgmr.msra.gmra.mxu2 %vm181_vm0, %v160_v7  ;;  %587 = vmatmul.msk.f32.vlgmr.msra.gmra.mxu3 %vm181_vm0, %v168_v11  ;;  %v166_v31 = vld [vmem:[%s672_s25 + $0xb0] sm:$0xff]  ;;  %v159_v33 = vld [vmem:[%s672_s25 + $0x78] sm:$0xff] }
  0x18   : > { %v174_v34 = vld [vmem:[%s672_s25 + $0xf0] sm:$0xff]  ;;  %v167_v35 = vld [vmem:[%s672_s25 + $0xb8] sm:$0xff] }
  0x19   : > { %v175_v36 = vld [vmem:[%s672_s25 + $0xf8] sm:$0xff] }
  0x1d   : > { %564 = vmatmul.msk.f32.gmra.mxu0 %vm181_vm0, %v145_v8  ;;  %572 = vmatmul.msk.f32.gmra.mxu1 %vm181_vm0, %v153_v9 }
  0x1f   : > { %580 = vmatmul.msk.f32.gmra.mxu2 %vm181_vm0, %v161_v10  ;;  %588 = vmatmul.msk.f32.gmra.mxu3 %vm181_vm0, %v169_v15 }
  0x25   : > { %565 = vmatmul.msk.f32.gmra.mxu0 %vm181_vm0, %v146_v12  ;;  %573 = vmatmul.msk.f32.gmra.mxu1 %vm181_vm0, %v154_v13 }
  0x27   : > { %581 = vmatmul.msk.f32.gmra.mxu2 %vm181_vm0, %v162_v14  ;;  %589 = vmatmul.msk.f32.gmra.mxu3 %vm181_vm0, %v170_v19 }
  0x2d   : > { %566 = vmatmul.msk.f32.gmra.mxu0 %vm181_vm0, %v147_v16  ;;  %574 = vmatmul.msk.f32.gmra.mxu1 %vm181_vm0, %v155_v17 }
  0x2f   : > { %582 = vmatmul.msk.f32.gmra.mxu2 %vm181_vm0, %v163_v18  ;;  %590 = vmatmul.msk.f32.gmra.mxu3 %vm181_vm0, %v171_v22 }
  0x35   : > { %567 = vmatmul.msk.f32.gmra.mxu0 %vm181_vm0, %v148_v20  ;;  %575 = vmatmul.msk.f32.gmra.mxu1 %vm181_vm0, %v156_v21 }
  0x37   : > { %583 = vmatmul.msk.f32.gmra.mxu2 %vm181_vm0, %v164_v23  ;;  %591 = vmatmul.msk.f32.gmra.mxu3 %vm181_vm0, %v172_v26 }
  0x3d   : > { %568 = vmatmul.msk.f32.gmra.mxu0 %vm181_vm0, %v149_v24  ;;  %576 = vmatmul.msk.f32.gmra.mxu1 %vm181_vm0, %v157_v25 }
  0x3f   : > { %584 = vmatmul.msk.f32.gmra.mxu2 %vm181_vm0, %v165_v27  ;;  %592 = vmatmul.msk.f32.gmra.mxu3 %vm181_vm0, %v173_v30 }
  0x45   : > { %569 = vmatmul.msk.f32.gmra.mxu0 %vm181_vm0, %v150_v28  ;;  %577 = vmatmul.msk.f32.gmra.mxu1 %vm181_vm0, %v158_v29 }
  0x47   : > { %585 = vmatmul.msk.f32.gmra.mxu2 %vm181_vm0, %v166_v31  ;;  %593 = vmatmul.msk.f32.gmra.mxu3 %vm181_vm0, %v174_v34 }
  0x4d   : > { %570 = vmatmul.msk.f32.gmra.mxu0 %vm181_vm0, %v151_v32  ;;  %578 = vmatmul.msk.f32.gmra.mxu1 %vm181_vm0, %v159_v33 }
  0x4f   : > { %586 = vmatmul.msk.f32.gmra.mxu2 %vm181_vm0, %v167_v35  ;;  %594 = vmatmul.msk.f32.gmra.mxu3 %vm181_vm0, %v175_v36 }
  0x92   : > { %v295_v37 = vpop.f32.mrf.mxu0  ;;  %v319_v38 = vpop.f32.mrf.mxu1 }
  0x93   : > { %v428_v55 = vmul.f32 %v295_v37, %v295_v37  ;;  %v436_v17 = vmul.f32 %v319_v38, %v319_v38 }
  0x9a   : > { %v298_v39 = vpop.f32.mrf.mxu0  ;;  %v322_v40 = vpop.f32.mrf.mxu1 }
  0x9b   : > { %v738_v41 = vpop.f32.mrf.mxu2  ;;  %v742_v47 = vpop.f32.mrf.mxu3  ;;  %v429_v53 = vmul.f32 %v298_v39, %v298_v39  ;;  %v391_v56 = vadd.f32 %v298_v39, %v295_v37  ;;  %v437_v21 = vmul.f32 %v322_v40, %v322_v40 }
  0x9d   : > { %v460_v58 = vadd.f32 %v429_v53, %v428_v55  ;;  %v444_v53 = vmul.f32 %v738_v41, %v738_v41 }
  0xa2   : > { %v301_v42 = vpop.f32.mrf.mxu0  ;;  %v325_v43 = vpop.f32.mrf.mxu1 }
  0xa3   : > { %v740_v45 = vpop.f32.mrf.mxu2  ;;  %v746_v52 = vpop.f32.mrf.mxu3  ;;  %v430_v57 = vmul.f32 %v301_v42, %v301_v42  ;;  %v392_v59 = vadd.f32 %v391_v56, %v301_v42  ;;  %v438_v24 = vmul.f32 %v325_v43, %v325_v43 }
  0xa5   : > { %v461_v63 = vadd.f32 %v460_v58, %v430_v57 }
  0xaa   : > { %v304_v44 = vpop.f32.mrf.mxu0  ;;  %v328_v46 = vpop.f32.mrf.mxu1 }
  0xab   : > { %v744_v49 = vpop.f32.mrf.mxu2  ;;  %v431_v60 = vmul.f32 %v304_v44, %v304_v44  ;;  %v393_v0 = vadd.f32 %v392_v59, %v304_v44  ;;  %v750_v2 = vpop.f32.mrf.mxu3  ;;  %v439_v28 = vmul.f32 %v328_v46, %v328_v46 }
  0xac   : > { %v446_v58 = vmul.f32 %v744_v49, %v744_v49 }
  0xad   : > { %v462_v3 = vadd.f32 %v461_v63, %v431_v60 }
  0xb2   : > { %v307_v48 = vpop.f32.mrf.mxu0  ;;  %v331_v50 = vpop.f32.mrf.mxu1 }
  0xb3   : > { %v748_v54 = vpop.f32.mrf.mxu2  ;;  %v432_v1 = vmul.f32 %v307_v48, %v307_v48  ;;  %v394_v4 = vadd.f32 %v393_v0, %v307_v48  ;;  %v752_v20 = vpop.f32.mrf.mxu3  ;;  %v440_v31 = vmul.f32 %v331_v50, %v331_v50 }
  0xb5   : > { %v463_v6 = vadd.f32 %v462_v3, %v432_v1 }
  0xba   : > { %v310_v51 = vpop.f32.mrf.mxu0  ;;  %v334_v62 = vpop.f32.mrf.mxu1 }
  0xbb   : > { %v433_v5 = vmul.f32 %v310_v51, %v310_v51  ;;  %v395_v7 = vadd.f32 %v394_v4, %v310_v51  ;;  %v355_v9 = vpop.f32.mrf.mxu2  ;;  %v441_v36 = vmul.f32 %v334_v62, %v334_v62 }
  0xbc   : > { %v448_v0 = vmul.f32 %v355_v9, %v355_v9 }
  0xbd   : > { %v464_v10 = vadd.f32 %v463_v6, %v433_v5 }
  0xc2   : > { %v313_v61 = vpop.f32.mrf.mxu0  ;;  %v337_v16 = vpop.f32.mrf.mxu1 }
  0xc3   : > { %v434_v8 = vmul.f32 %v313_v61, %v313_v61  ;;  %v396_v11 = vadd.f32 %v395_v7, %v313_v61  ;;  %v358_v27 = vpop.f32.mrf.mxu2  ;;  %v442_v44 = vmul.f32 %v337_v16, %v337_v16 }
  0xc5   : > { %v465_v13 = vadd.f32 %v464_v10, %v434_v8 }
  0xca   : > { %v316_v12 = vpop.f32.mrf.mxu0  ;;  %v340_v34 = vpop.f32.mrf.mxu1 }
  0xcb   : > { %v397_v14 = vadd.f32 %v396_v11, %v316_v12  ;;  %v435_v15 = vmul.f32 %v316_v12, %v316_v12 }
  0xcd   : > { %v398_v18 = vadd.f32 %v397_v14, %v319_v38  ;;  %v466_v19 = vadd.f32 %v465_v13, %v435_v15  ;;  %v379_v38 = vpop.f32.mrf.mxu3  ;;  %v452_v14 = vmul.f32 %v742_v47, %v742_v47 }
  0xcf   : > { %v399_v22 = vadd.f32 %v398_v18, %v322_v40  ;;  %v467_v23 = vadd.f32 %v466_v19, %v436_v17  ;;  %v443_v40 = vmul.f32 %v340_v34, %v340_v34  ;;  %v454_v18 = vmul.f32 %v750_v2, %v750_v2 }
  0xd1   : > { %v400_v25 = vadd.f32 %v399_v22, %v325_v43  ;;  %v468_v26 = vadd.f32 %v467_v23, %v437_v21  ;;  %v361_v43 = vpop.f32.mrf.mxu2  ;;  %v455_v22 = vmul.f32 %v752_v20, %v752_v20 }
  0xd2   : > { %v450_v10 = vmul.f32 %v361_v43, %v361_v43 }
  0xd3   : > { %v469_v29 = vadd.f32 %v468_v26, %v438_v24  ;;  %v401_v30 = vadd.f32 %v400_v25, %v328_v46 }
  0xd5   : > { %v402_v32 = vadd.f32 %v401_v30, %v331_v50  ;;  %v470_v33 = vadd.f32 %v469_v29, %v439_v28  ;;  %v445_v50 = vmul.f32 %v740_v45, %v740_v45  ;;  %v382_v61 = vpop.f32.mrf.mxu3 }
  0xd7   : > { %v403_v35 = vadd.f32 %v402_v32, %v334_v62  ;;  %v471_v37 = vadd.f32 %v470_v33, %v440_v31  ;;  %v447_v62 = vmul.f32 %v748_v54, %v748_v54 }
  0xd9   : > { %v472_v39 = vadd.f32 %v471_v37, %v441_v36  ;;  %v404_v42 = vadd.f32 %v403_v35, %v337_v16  ;;  %v364_v4 = vpop.f32.mrf.mxu2 }
  0xda   : > { %v451_v11 = vmul.f32 %v364_v4, %v364_v4 }
  0xdb   : > { %v473_v48 = vadd.f32 %v472_v39, %v442_v44  ;;  %v405_v51 = vadd.f32 %v404_v42, %v340_v34 }
  0xdd   : > { %v406_v46 = vadd.f32 %v405_v51, %v738_v41  ;;  %v474_v55 = vadd.f32 %v473_v48, %v443_v40  ;;  %v385_v13 = vpop.f32.mrf.mxu3 }
  0xde   : > { %v458_v32 = vmul.f32 %v385_v13, %v385_v13 }
  0xdf   : > { %v407_v56 = vadd.f32 %v406_v46, %v740_v45  ;;  %v475_v57 = vadd.f32 %v474_v55, %v444_v53  ;;  %v449_v45 = vmul.f32 %v358_v27, %v358_v27 }
  0xe1   : > { %v408_v59 = vadd.f32 %v407_v56, %v744_v49  ;;  %v476_v60 = vadd.f32 %v475_v57, %v445_v50 }
  0xe3   : > { %v477_v63 = vadd.f32 %v476_v60, %v446_v58  ;;  %v409_v41 = vadd.f32 %v408_v59, %v748_v54 }
  0xe5   : > { %v410_v1 = vadd.f32 %v409_v41, %v355_v9  ;;  %v478_v3 = vadd.f32 %v477_v63, %v447_v62  ;;  %v453_v9 = vmul.f32 %v746_v52, %v746_v52 }
  0xe7   : > { %v411_v5 = vadd.f32 %v410_v1, %v358_v27  ;;  %v479_v6 = vadd.f32 %v478_v3, %v448_v0  ;;  %v388_v27 = vpop.f32.mrf.mxu3 }
  0xe9   : > { %v480_v7 = vadd.f32 %v479_v6, %v449_v45  ;;  %v412_v8 = vadd.f32 %v411_v5, %v361_v43 }
  0xeb   : > { %v481_v49 = vadd.f32 %v480_v7, %v450_v10  ;;  %v413_v12 = vadd.f32 %v412_v8, %v364_v4 }
  0xed   : > { %v414_v15 = vadd.f32 %v413_v12, %v742_v47  ;;  %v482_v54 = vadd.f32 %v481_v49, %v451_v11  ;;  %v456_v47 = vmul.f32 %v379_v38, %v379_v38 }
  0xef   : > { %v415_v16 = vadd.f32 %v414_v15, %v746_v52  ;;  %v483_v17 = vadd.f32 %v482_v54, %v452_v14  ;;  %v457_v52 = vmul.f32 %v382_v61, %v382_v61 }
  0xf1   : > { %v416_v19 = vadd.f32 %v415_v16, %v750_v2  ;;  %v484_v21 = vadd.f32 %v483_v17, %v453_v9  ;;  %v459_v2 = vmul.f32 %v388_v27, %v388_v27 }
  0xf3   : > { %v485_v23 = vadd.f32 %v484_v21, %v454_v18  ;;  %v417_v24 = vadd.f32 %v416_v19, %v752_v20 }
  0xf5   : > { %v418_v25 = vadd.f32 %v417_v24, %v379_v38  ;;  %v486_v26 = vadd.f32 %v485_v23, %v455_v22 }
  0xf7   : > { %v419_v28 = vadd.f32 %v418_v25, %v382_v61  ;;  %v487_v29 = vadd.f32 %v486_v26, %v456_v47 }
  0xf9   : > { %v488_v30 = vadd.f32 %v487_v29, %v457_v52  ;;  %v420_v31 = vadd.f32 %v419_v28, %v385_v13 }
  0xfb   : > { %v489_v33 = vadd.f32 %v488_v30, %v458_v32  ;;  %v421_v34 = vadd.f32 %v420_v31, %v388_v27 }
  0xfd   : > { %v422_v35 = vrot.slane %v421_v34, 4  ;;  %v490_v36 = vadd.f32 %v489_v33, %v459_v2 }
  0xff   : > { %v423_v37 = vadd.f32 %v422_v35, %v421_v34  ;;  %v491_v20 = vrot.slane %v490_v36, 4 }
 0x101   : > { %v424_v39 = vrot.slane %v423_v37, 2  ;;  %v492_v42 = vadd.f32 %v491_v20, %v490_v36 }
 0x103   : > { %v425_v38 = vadd.f32 %v424_v39, %v423_v37  ;;  %v493_v44 = vrot.slane %v492_v42, 2 }
 0x105   : > { %v426_v40 = vrot.slane %v425_v38, 1  ;;  %v494_v48 = vadd.f32 %v493_v44, %v492_v42 }
 0x107   : > { %v495_v51 = vrot.slane %v494_v48, 1  ;;  %v427_v43 = vadd.f32 %v426_v40, %v425_v38 }
 0x109   : > { %v496_v53 = vadd.f32 %v495_v51, %v494_v48 }
 0x10b   : > { %v498_v46 = vsel %vm497_vm1, %v427_v43, %v496_v53 }
 0x10c   : > { %v500_v55 = vsel %vm499_vm2, %v498_v46, 0.0 }
 0x10d   : > { %501 = vst [vmem:[%s143_s29] sm:$0xff] %v500_v55 }
 0x10e PF: > { %s12_s9 = sadd.s32 1, %s626_s9  }
 0x10f   : > { %p9_p5 = scmp.ge.s32.totalorder %s12_s9, 4  }
 0x111   :  { %11 = sbr.rel (!%p9_p5) target bundleno = 1 (0x1), region = 58 }

</bundles_post_ra>
